<compile_context>
chip_gen: v6e
topology: v6e:2x2x1
jax: 0.10.0
libtpu: 0.0.40
codegen_flags: <defaults>
</compile_context>

<pallas_src>
import functools
import math

import jax
import jax.numpy as jnp
from jax.experimental import pallas as pl
from jax.experimental.pallas import tpu as pltpu


# Explicit scoped-VMEM budget (perf review, v7x item): tiles below are chosen so that
# inputs + outputs x double-buffering stay far below 32 MiB, which fits every
# generation (v5e/v6e 128 MiB, v7x 64 MiB physical).
_VMEM_LIMIT_BYTES = 32 * 1024 * 1024
# Sequence/row tile cap: ~512 rows gives ~85% of HBM roofline (measured on v6e) while
# leaving plenty of VMEM headroom on v7x.
_TILE_ROWS = 512


def _cparams(dimension_semantics):
    return pltpu.CompilerParams(
        dimension_semantics=dimension_semantics,
        vmem_limit_bytes=_VMEM_LIMIT_BYTES,
    )


def _row_tile(m):
    # full extent when small (always a legal block), otherwise 512 (multiple of 8).
    return m if m <= _TILE_ROWS else _TILE_ROWS


# ----------------------------------------------------------------------------------
# Positional-encoding table (init-time buffer, identical to the PyTorch register_buffer)
# ----------------------------------------------------------------------------------
def make_positional_encoding_table(emb: int, max_len: int = 3000) -> jnp.ndarray:
    # Correctness note from review: the interleave below requires an even emb.
    assert emb % 2 == 0, "sinusoidal positional encoding requires an even embedding dim"
    position = jnp.arange(0, max_len, dtype=jnp.float32)[:, None]              # (max_len, 1)
    div_term = jnp.exp(
        jnp.arange(0, emb, 2, dtype=jnp.float32) * (-math.log(10000.0) / emb)
    )                                                                           # (emb//2,)
    angles = position * div_term                                                # (max_len, emb//2)
    pe = jnp.stack([jnp.sin(angles), jnp.cos(angles)], axis=-1).reshape(max_len, emb)
    return pe[None, :, :]                                                       # (1, max_len, emb)


# ----------------------------------------------------------------------------------
# Kernel 1: input embedding (Linear) + positional-encoding add, fused
# ----------------------------------------------------------------------------------
def _embed_pe_kernel(x_ref, w_ref, b_ref, pe_ref, o_ref):
    # x_ref: (1, TN, Din)   w_ref: (Din, D)   b_ref: (1, D)   pe_ref: (1, TN, D)
    y = jnp.dot(x_ref[0], w_ref[...], preferred_element_type=jnp.float32)
    y = y + b_ref[...] + pe_ref[0]
    o_ref[0] = y.astype(o_ref.dtype)


def embed_with_pe(x, w, b, pe):
    """x:(bs,n,Din), w:(Din,D), b:(D,), pe:(1,max_len,D) -> (bs,n,D) = x@w + b + pe[:, :n]."""
    bs, n, d_in = x.shape
    d_out = w.shape[1]
    tn = _row_tile(n)  # sequence tile (perf review: grid=(bs, cdiv(n, TILE_N)))

    # pe is passed whole; the BlockSpec index_map selects the needed rows (no eager
    # pe[:, :n, :] copy in the wrapper).  The pe block needs tn % 8 == 0 (or full);
    # the rare ragged case (n < 512 and n % 8 != 0) falls back to one static slice.
    pe_arg = pe
    if tn != pe.shape[1] and tn % 8 != 0:
        pe_arg = jax.lax.slice(pe, (0, 0, 0), (1, n, d_out))

    grid = (bs, pl.cdiv(n, tn))
    return pl.pallas_call(
        _embed_pe_kernel,
        out_shape=jax.ShapeDtypeStruct((bs, n, d_out), x.dtype),
        grid_spec=pltpu.PrefetchScalarGridSpec(
            num_scalar_prefetch=0,
            grid=grid,
            in_specs=[
                pl.BlockSpec((1, tn, d_in), lambda bi, si: (bi, si, 0)),
                # Constant-index blocks (w, b): Pallas skips re-DMA across grid steps.
                # (Not shrinking to Buffered(1): at these tile sizes the extra buffer is
                #  negligible vs the 32 MiB budget.)
                pl.BlockSpec((d_in, d_out), lambda bi, si: (0, 0)),
                pl.BlockSpec((1, d_out), lambda bi, si: (0, 0)),
                pl.BlockSpec((1, tn, d_out), lambda bi, si: (0, si, 0)),
            ],
            out_specs=pl.BlockSpec((1, tn, d_out), lambda bi, si: (bi, si, 0)),
        ),
        # both axes parallel -> shardable across the 2 TensorCores on v7x
        compiler_params=_cparams(("parallel", "parallel")),
    )(x, w, b.reshape(1, d_out), pe_arg)


# ----------------------------------------------------------------------------------
# Kernel 2: generic Linear (optionally fused ReLU)
# ----------------------------------------------------------------------------------
def _linear_kernel(x_ref, w_ref, b_ref, o_ref, *, activation):
    y = jnp.dot(x_ref[...], w_ref[...], preferred_element_type=jnp.float32)
    y = y + b_ref[...]
    if activation == "relu":
        y = jnp.maximum(y, 0.0)
    o_ref[...] = y.astype(o_ref.dtype)


def linear_pallas(x, w, b=None, activation=None):
    """x:(M,K) @ w:(K,N) + b, rows tiled over the grid."""
    m, k = x.shape
    k2, n = w.shape
    assert k2 == k
    if b is None:
        b = jnp.zeros((n,), dtype=x.dtype)
    tm = _row_tile(m)
    return pl.pallas_call(
        functools.partial(_linear_kernel, activation=activation),
        out_shape=jax.ShapeDtypeStruct((m, n), x.dtype),
        grid_spec=pltpu.PrefetchScalarGridSpec(
            num_scalar_prefetch=0,
            grid=(pl.cdiv(m, tm),),
            in_specs=[
                pl.BlockSpec((tm, k), lambda i: (i, 0)),
                pl.BlockSpec((k, n), lambda i: (0, 0)),
                pl.BlockSpec((1, n), lambda i: (0, 0)),
            ],
            out_specs=pl.BlockSpec((tm, n), lambda i: (i, 0)),
        ),
        compiler_params=_cparams(("parallel",)),
    )(x, w, b.reshape(1, n))


# ----------------------------------------------------------------------------------
# Kernel 3: causal ('all') masked softmax attention, one (batch*head) per grid step
# ----------------------------------------------------------------------------------
def _attn_kernel(q_ref, k_ref, v_ref, o_ref, *, scale):
    q = q_ref[0]                                     # (n, hd)
    k = k_ref[0]
    v = v_ref[0]
    s = jax.lax.dot_general(
        q, k, (((1,), (1,)), ((), ())), preferred_element_type=jnp.float32
    ) * scale                                        # (n_q, n_kv)
    nq, nk = s.shape
    row = jax.lax.broadcasted_iota(jnp.int32, (nq, nk), 0)
    col = jax.lax.broadcasted_iota(jnp.int32, (nq, nk), 1)
    s = jnp.where(row >= col, s, -jnp.inf)           # att_type='all' => causal mask
    m = jnp.max(s, axis=-1, keepdims=True)
    p = jnp.exp(s - m)
    p = p / jnp.sum(p, axis=-1, keepdims=True)
    o = jnp.dot(p, v, preferred_element_type=jnp.float32)
    o_ref[0] = o.astype(o_ref.dtype)


def attention_pallas(q, k, v, *, scale):
    """q,k,v: (bs*heads, n, hd) -> (bs*heads, n, hd)."""
    bh, n, hd = q.shape
    spec = pl.BlockSpec((1, n, hd), lambda i: (i, 0, 0))
    return pl.pallas_call(
        functools.partial(_attn_kernel, scale=scale),
        out_shape=jax.ShapeDtypeStruct((bh, n, hd), q.dtype),
        grid_spec=pltpu.PrefetchScalarGridSpec(
            num_scalar_prefetch=0,
            grid=(bh,),
            in_specs=[spec, spec, spec],
            out_specs=spec,
        ),
        compiler_params=_cparams(("parallel",)),
    )(q, k, v)
    # TODO(synk): for long sequences this should become a flash-style kv-tiled kernel.


# ----------------------------------------------------------------------------------
# Kernel 4: residual add + LayerNorm, fused
# ----------------------------------------------------------------------------------
def _add_ln_kernel(a_ref, b_ref, g_ref, beta_ref, o_ref, *, eps):
    z = a_ref[...] + b_ref[...]
    mu = jnp.mean(z, axis=-1, keepdims=True)
    zc = z - mu
    var = jnp.mean(zc * zc, axis=-1, keepdims=True)
    inv = jax.lax.rsqrt(var + eps)
    o_ref[...] = (zc * inv * g_ref[...] + beta_ref[...]).astype(o_ref.dtype)


def add_layernorm_pallas(a, b, gamma, beta, *, eps=1e-5):
    """LayerNorm(a + b) over the last dim (matches torch.nn.LayerNorm, eps=1e-5)."""
    m, d = a.shape
    tm = _row_tile(m)
    return pl.pallas_call(
        functools.partial(_add_ln_kernel, eps=eps),
        out_shape=jax.ShapeDtypeStruct((m, d), a.dtype),
        grid_spec=pltpu.PrefetchScalarGridSpec(
            num_scalar_prefetch=0,
            grid=(pl.cdiv(m, tm),),
            in_specs=[
                pl.BlockSpec((tm, d), lambda i: (i, 0)),
                pl.BlockSpec((tm, d), lambda i: (i, 0)),
                pl.BlockSpec((1, d), lambda i: (0, 0)),
                pl.BlockSpec((1, d), lambda i: (0, 0)),
            ],
            out_specs=pl.BlockSpec((tm, d), lambda i: (i, 0)),
        ),
        compiler_params=_cparams(("parallel",)),
    )(a, b, gamma.reshape(1, d), beta.reshape(1, d))


# ----------------------------------------------------------------------------------
# Full forward (glue between kernels is shape plumbing only)
# ----------------------------------------------------------------------------------
def transformer_block_forward(x, p, heads):
    bs, n, d = x.shape
    h3 = p["w_qkv"].shape[1]
    H = h3 // 3
    hd = H // heads
    x2 = x.reshape(bs * n, d)

    # Fused QKV projection: one matmul, one read of x instead of three (bias-free in the module).
    qkv = linear_pallas(x2, p["w_qkv"])                              # (bs*n, 3H)
    q, k, v = jnp.split(qkv, 3, axis=-1)

    def split_heads(t):                                              # (bs*n, H) -> (bs*heads, n, hd)
        return (t.reshape(bs, n, heads, hd)
                 .transpose(0, 2, 1, 3)
                 .reshape(bs * heads, n, hd))

    q, k, v = split_heads(q), split_heads(k), split_heads(v)
    # queries /= sqrt(hd) and keys /= sqrt(hd)  =>  scores scaled by 1/hd
    att = attention_pallas(q, k, v, scale=1.0 / hd)                  # (bs*heads, n, hd)
    att = (att.reshape(bs, heads, n, hd)
              .transpose(0, 2, 1, 3)
              .reshape(bs * n, H))
    att = linear_pallas(att, p["w_unify"], p["b_unify"])             # unifyheads

    y = add_layernorm_pallas(att, x2, p["ln1_g"], p["ln1_b"])        # norm1(attended + x)
    ff = linear_pallas(y, p["w_ff1"], p["b_ff1"], activation="relu")
    ff = linear_pallas(ff, p["w_ff2"], p["b_ff2"])
    y = add_layernorm_pallas(ff, y, p["ln2_g"], p["ln2_b"])          # norm2(ff + x)
    return y.reshape(bs, n, d)                                       # dropout(p=0) == identity


def transformer_forward(x, params, *, heads):
    y = embed_with_pe(x, params["w_embed"], params["b_embed"], params["pe"])
    for blk in params["blocks"]:
        y = transformer_block_forward(y, blk, heads)
    return y


# ----------------------------------------------------------------------------------
# Pure-JAX reference (same math, XLA ops) for validation
# ----------------------------------------------------------------------------------
_HI = jax.lax.Precision.HIGHEST


def _ref_layernorm(z, g, b, eps=1e-5):
    mu = jnp.mean(z, axis=-1, keepdims=True)
    var = jnp.mean((z - mu) ** 2, axis=-1, keepdims=True)
    return (z - mu) / jnp.sqrt(var + eps) * g + b


def reference_forward(x, params, heads):
    bs, n, _ = x.shape
    y = jnp.einsum("bnd,dh->bnh", x, params["w_embed"], precision=_HI) + params["b_embed"]
    y = y + params["pe"][:, :n, :]
    for p in params["blocks"]:
        H = p["w_qkv"].shape[1] // 3
        hd = H // heads
        qkv = jnp.einsum("bnd,dh->bnh", y, p["w_qkv"], precision=_HI)
        q, k, v = jnp.split(qkv, 3, axis=-1)

        def sh(t):
            return t.reshape(bs, n, heads, hd).transpose(0, 2, 1, 3)

        q, k, v = sh(q), sh(k), sh(v)
        s = jnp.einsum("bhqd,bhkd->bhqk", q, k, precision=_HI) / hd
        mask = jnp.arange(n)[:, None] >= jnp.arange(n)[None, :]
        s = jnp.where(mask, s, -jnp.inf)
        a = jax.nn.softmax(s, axis=-1)
        o = jnp.einsum("bhqk,bhkd->bhqd", a, v, precision=_HI)
        o = o.transpose(0, 2, 1, 3).reshape(bs, n, H)
        o = jnp.einsum("bnh,hd->bnd", o, p["w_unify"], precision=_HI) + p["b_unify"]
        y = _ref_layernorm(o + y, p["ln1_g"], p["ln1_b"])
        ff = jnp.maximum(
            jnp.einsum("bnd,df->bnf", y, p["w_ff1"], precision=_HI) + p["b_ff1"], 0.0)
        ff = jnp.einsum("bnf,fd->bnd", ff, p["w_ff2"], precision=_HI) + p["b_ff2"]
        y = _ref_layernorm(ff + y, p["ln2_g"], p["ln2_b"])
    return y


# ----------------------------------------------------------------------------------
# Deterministic parameter construction
# ----------------------------------------------------------------------------------
def init_params(key, emb_in, hidden, heads, ff_hidden_mult, depth, max_len=3000):
    d = hidden
    H = heads * hidden                  # per-head dim == hidden in this module
    f = ff_hidden_mult * d
    keys = jax.random.split(key, 2 + depth * 6)

    def dense(k, fan_in, fan_out):
        return jax.random.normal(k, (fan_in, fan_out), jnp.float32) / math.sqrt(fan_in)

    params = {
        "w_embed": dense(keys[0], emb_in, d),
        "b_embed": 0.01 * jax.random.normal(keys[1], (d,), jnp.float32),
        "pe": make_positional_encoding_table(d, max_len),
        "blocks": [],
    }
    ki = 2
    for _ in range(depth):
        params["blocks"].append({
            "w_qkv": dense(keys[ki + 0], d, 3 * H),          # [Wq | Wk | Wv], bias-free
            "w_unify": dense(keys[ki + 1], H, d),
            "b_unify": 0.01 * jax.random.normal(keys[ki + 2], (d,), jnp.float32),
            "ln1_g": jnp.ones((d,), jnp.float32),
            "ln1_b": jnp.zeros((d,), jnp.float32),
            "w_ff1": dense(keys[ki + 3], d, f),
            "b_ff1": 0.01 * jax.random.normal(keys[ki + 4], (f,), jnp.float32),
            "w_ff2": dense(keys[ki + 5], f, d),
            "b_ff2": jnp.zeros((d,), jnp.float32),
            "ln2_g": jnp.ones((d,), jnp.float32),
            "ln2_b": jnp.zeros((d,), jnp.float32),
        })
        ki += 6
    return params


if __name__ == "__main__":
    bs, n = 2, 8
    emb_in = 32          # raw input feature dim ("emb" argument of Transformer)
    hidden = 32          # model dim after input_embedding
    heads = 4
    ff_hidden_mult = 2
    depth = 2

    key = jax.random.PRNGKey(0)
    k_x, k_p = jax.random.split(key)
    x = jax.random.normal(k_x, (bs, n, emb_in), dtype=jnp.float32)
    params = init_params(k_p, emb_in, hidden, heads, ff_hidden_mult, depth)

    fwd = jax.jit(functools.partial(transformer_forward, heads=heads))
    out = jax.block_until_ready(fwd(x, params))

    ref = reference_forward(x, params, heads)
    assert out.shape == (bs, n, hidden)
    assert bool(jnp.all(jnp.isfinite(out)))
    assert jnp.allclose(out, ref, atol=1e-2, rtol=1e-2), float(jnp.max(jnp.abs(out - ref)))

    print("KERNEL_OK")
</pallas_src>

<mosaic_0001>
module attributes {stable_mosaic.version = 11 : i64} {
  func.func @_embed_pe_kernel(%arg0: i32, %arg1: i32, %arg2: memref<1x8x32xf32, #tpu.memory_space<vmem>>, %arg3: memref<32x32xf32, #tpu.memory_space<vmem>>, %arg4: memref<1x32xf32, #tpu.memory_space<vmem>>, %arg5: memref<1x8x32xf32, #tpu.memory_space<vmem>>, %arg6: memref<1x8x32xf32, #tpu.memory_space<vmem>>) attributes {dimension_semantics = [#tpu.dimension_semantics<parallel>, #tpu.dimension_semantics<parallel>], iteration_bounds = array<i64: 2, 1>, scalar_prefetch = 0 : i64, scratch_operands = 0 : i64, tpu.core_type = #tpu.core_type<tc>, window_params = [{transform_indices = @transform_0, window_bounds = array<i64: 1, 8, 32>}, {pipeline_mode = #tpu.pipeline_mode<synchronous>, transform_indices = @transform_1, window_bounds = array<i64: 32, 32>}, {pipeline_mode = #tpu.pipeline_mode<synchronous>, transform_indices = @transform_2, window_bounds = array<i64: 1, 32>}, {transform_indices = @transform_3, window_bounds = array<i64: 1, 8, 32>}, {transform_indices = @transform_4, window_bounds = array<i64: 1, 8, 32>}]} {
    %c0 = arith.constant 0 : index
    %c0_0 = arith.constant 0 : index
    %c0_1 = arith.constant 0 : index
    %0 = vector.load %arg2[%c0, %c0_0, %c0_1] : memref<1x8x32xf32, #tpu.memory_space<vmem>>, vector<1x8x32xf32>
    %1 = vector.shape_cast %0 : vector<1x8x32xf32> to vector<8x32xf32>
    %c0_2 = arith.constant 0 : index
    %c0_3 = arith.constant 0 : index
    %2 = vector.load %arg3[%c0_2, %c0_3] : memref<32x32xf32, #tpu.memory_space<vmem>>, vector<32x32xf32>
    %cst = arith.constant dense<0.000000e+00> : vector<8x32xf32>
    %3 = tpu.matmul %1, %2, %cst {dimension_numbers = #tpu.dot_dimension_numbers<[1], [0], [0], [1], [0, 0, 1, 1], [], []>} : vector<8x32xf32>, vector<32x32xf32>, vector<8x32xf32> -> vector<8x32xf32>
    %c0_4 = arith.constant 0 : index
    %c0_5 = arith.constant 0 : index
    %4 = vector.load %arg4[%c0_4, %c0_5] : memref<1x32xf32, #tpu.memory_space<vmem>>, vector<1x32xf32>
    %5 = vector.broadcast %4 : vector<1x32xf32> to vector<8x32xf32>
    %6 = arith.addf %3, %5 : vector<8x32xf32>
    %c0_6 = arith.constant 0 : index
    %c0_7 = arith.constant 0 : index
    %c0_8 = arith.constant 0 : index
    %7 = vector.load %arg5[%c0_6, %c0_7, %c0_8] : memref<1x8x32xf32, #tpu.memory_space<vmem>>, vector<1x8x32xf32>
    %8 = vector.shape_cast %7 : vector<1x8x32xf32> to vector<8x32xf32>
    %9 = arith.addf %6, %8 : vector<8x32xf32>
    %c0_9 = arith.constant 0 : index
    %c0_10 = arith.constant 0 : index
    %c0_11 = arith.constant 0 : index
    %10 = vector.load %arg6[%c0_9, %c0_10, %c0_11] : memref<1x8x32xf32, #tpu.memory_space<vmem>>, vector<1x8x32xf32>
    %11 = vector.shape_cast %10 : vector<1x8x32xf32> to vector<8x32xf32>
    %12 = vector.shape_cast %9 : vector<8x32xf32> to vector<1x8x32xf32>
    tpu.vector_store %arg6[%c0_9, %c0_10, %c0_11], %12 {strides = array<i32>} : memref<1x8x32xf32, #tpu.memory_space<vmem>>, vector<1x8x32xf32>,
    return
  }
  func.func @transform_0(%arg0: i32, %arg1: i32) -> (i32, i32, i32) {
    %c0_i32 = arith.constant 0 : i32
    %c0_i32_0 = arith.constant 0 : i32
    return %arg0, %arg1, %c0_i32 : i32, i32, i32
  }
  func.func @transform_1(%arg0: i32, %arg1: i32) -> (i32, i32) {
    %c0_i32 = arith.constant 0 : i32
    %c0_i32_0 = arith.constant 0 : i32
    %c0_i32_1 = arith.constant 0 : i32
    return %c0_i32, %c0_i32_0 : i32, i32
  }
  func.func @transform_2(%arg0: i32, %arg1: i32) -> (i32, i32) {
    %c0_i32 = arith.constant 0 : i32
    %c0_i32_0 = arith.constant 0 : i32
    %c0_i32_1 = arith.constant 0 : i32
    return %c0_i32, %c0_i32_0 : i32, i32
  }
  func.func @transform_3(%arg0: i32, %arg1: i32) -> (i32, i32, i32) {
    %c0_i32 = arith.constant 0 : i32
    %c0_i32_0 = arith.constant 0 : i32
    %c0_i32_1 = arith.constant 0 : i32
    return %c0_i32, %arg1, %c0_i32_0 : i32, i32, i32
  }
  func.func @transform_4(%arg0: i32, %arg1: i32) -> (i32, i32, i32) {
    %c0_i32 = arith.constant 0 : i32
    %c0_i32_0 = arith.constant 0 : i32
    return %arg0, %arg1, %c0_i32 : i32, i32, i32
  }
}

module attributes {stable_mosaic.version = 11 : i64} {
  func.func @_linear_kernel(%arg0: i32, %arg1: memref<16x32xf32, #tpu.memory_space<vmem>>, %arg2: memref<32x384xf32, #tpu.memory_space<vmem>>, %arg3: memref<1x384xf32, #tpu.memory_space<vmem>>, %arg4: memref<16x384xf32, #tpu.memory_space<vmem>>) attributes {dimension_semantics = [#tpu.dimension_semantics<parallel>], iteration_bounds = array<i64: 1>, scalar_prefetch = 0 : i64, scratch_operands = 0 : i64, tpu.core_type = #tpu.core_type<tc>, window_params = [{transform_indices = @transform_0, window_bounds = array<i64: 16, 32>}, {pipeline_mode = #tpu.pipeline_mode<synchronous>, transform_indices = @transform_1, window_bounds = array<i64: 32, 384>}, {pipeline_mode = #tpu.pipeline_mode<synchronous>, transform_indices = @transform_2, window_bounds = array<i64: 1, 384>}, {transform_indices = @transform_3, window_bounds = array<i64: 16, 384>}]} {
    %c0 = arith.constant 0 : index
    %c0_0 = arith.constant 0 : index
    %0 = vector.load %arg1[%c0, %c0_0] : memref<16x32xf32, #tpu.memory_space<vmem>>, vector<16x32xf32>
    %c0_1 = arith.constant 0 : index
    %c0_2 = arith.constant 0 : index
    %1 = vector.load %arg2[%c0_1, %c0_2] : memref<32x384xf32, #tpu.memory_space<vmem>>, vector<32x384xf32>
    %cst = arith.constant dense<0.000000e+00> : vector<16x384xf32>
    %2 = tpu.matmul %0, %1, %cst {dimension_numbers = #tpu.dot_dimension_numbers<[1], [0], [0], [1], [0, 0, 1, 1], [], []>} : vector<16x32xf32>, vector<32x384xf32>, vector<16x384xf32> -> vector<16x384xf32>
    %c0_3 = arith.constant 0 : index
    %c0_4 = arith.constant 0 : index
    %3 = vector.load %arg3[%c0_3, %c0_4] : memref<1x384xf32, #tpu.memory_space<vmem>>, vector<1x384xf32>
    %4 = vector.broadcast %3 : vector<1x384xf32> to vector<16x384xf32>
    %5 = arith.addf %2, %4 : vector<16x384xf32>
    %c0_5 = arith.constant 0 : index
    %c0_6 = arith.constant 0 : index
    %6 = vector.load %arg4[%c0_5, %c0_6] : memref<16x384xf32, #tpu.memory_space<vmem>>, vector<16x384xf32>
    tpu.vector_store %arg4[%c0_5, %c0_6], %5 {strides = array<i32>} : memref<16x384xf32, #tpu.memory_space<vmem>>, vector<16x384xf32>,
    return
  }
  func.func @transform_0(%arg0: i32) -> (i32, i32) {
    %c0_i32 = arith.constant 0 : i32
    %c0_i32_0 = arith.constant 0 : i32
    return %arg0, %c0_i32 : i32, i32
  }
  func.func @transform_1(%arg0: i32) -> (i32, i32) {
    %c0_i32 = arith.constant 0 : i32
    %c0_i32_0 = arith.constant 0 : i32
    %c0_i32_1 = arith.constant 0 : i32
    return %c0_i32, %c0_i32_0 : i32, i32
  }
  func.func @transform_2(%arg0: i32) -> (i32, i32) {
    %c0_i32 = arith.constant 0 : i32
    %c0_i32_0 = arith.constant 0 : i32
    %c0_i32_1 = arith.constant 0 : i32
    return %c0_i32, %c0_i32_0 : i32, i32
  }
  func.func @transform_3(%arg0: i32) -> (i32, i32) {
    %c0_i32 = arith.constant 0 : i32
    %c0_i32_0 = arith.constant 0 : i32
    return %arg0, %c0_i32 : i32, i32
  }
}

module attributes {stable_mosaic.version = 11 : i64} {
  func.func @_attn_kernel(%arg0: i32, %arg1: memref<1x8x32xf32, #tpu.memory_space<vmem>>, %arg2: memref<1x8x32xf32, #tpu.memory_space<vmem>>, %arg3: memref<1x8x32xf32, #tpu.memory_space<vmem>>, %arg4: memref<1x8x32xf32, #tpu.memory_space<vmem>>) attributes {dimension_semantics = [#tpu.dimension_semantics<parallel>], iteration_bounds = array<i64: 8>, scalar_prefetch = 0 : i64, scratch_operands = 0 : i64, tpu.core_type = #tpu.core_type<tc>, window_params = [{transform_indices = @transform_0, window_bounds = array<i64: 1, 8, 32>}, {transform_indices = @transform_1, window_bounds = array<i64: 1, 8, 32>}, {transform_indices = @transform_2, window_bounds = array<i64: 1, 8, 32>}, {transform_indices = @transform_3, window_bounds = array<i64: 1, 8, 32>}]} {
    %c0 = arith.constant 0 : index
    %c0_0 = arith.constant 0 : index
    %c0_1 = arith.constant 0 : index
    %0 = vector.load %arg1[%c0, %c0_0, %c0_1] : memref<1x8x32xf32, #tpu.memory_space<vmem>>, vector<1x8x32xf32>
    %1 = vector.shape_cast %0 : vector<1x8x32xf32> to vector<8x32xf32>
    %c0_2 = arith.constant 0 : index
    %c0_3 = arith.constant 0 : index
    %c0_4 = arith.constant 0 : index
    %2 = vector.load %arg2[%c0_2, %c0_3, %c0_4] : memref<1x8x32xf32, #tpu.memory_space<vmem>>, vector<1x8x32xf32>
    %3 = vector.shape_cast %2 : vector<1x8x32xf32> to vector<8x32xf32>
    %c0_5 = arith.constant 0 : index
    %c0_6 = arith.constant 0 : index
    %c0_7 = arith.constant 0 : index
    %4 = vector.load %arg3[%c0_5, %c0_6, %c0_7] : memref<1x8x32xf32, #tpu.memory_space<vmem>>, vector<1x8x32xf32>
    %5 = vector.shape_cast %4 : vector<1x8x32xf32> to vector<8x32xf32>
    %cst = arith.constant dense<0.000000e+00> : vector<8x8xf32>
    %6 = tpu.matmul %1, %3, %cst {dimension_numbers = #tpu.dot_dimension_numbers<[1], [1], [0], [0], [0, 0, 1, 0], [], []>} : vector<8x32xf32>, vector<8x32xf32>, vector<8x8xf32> -> vector<8x8xf32>
    %cst_8 = arith.constant 3.125000e-02 : f32
    %7 = vector.broadcast %cst_8 : f32 to vector<8x8xf32>
    %8 = arith.mulf %6, %7 : vector<8x8xf32>
    %9 = tpu.iota {dimensions = array<i32: 0>} : vector<8x8xi32>
    %10 = tpu.iota {dimensions = array<i32: 1>} : vector<8x8xi32>
    %11 = arith.cmpi sge, %9, %10 : vector<8x8xi32>
    %cst_9 = arith.constant 0xFF800000 : f32
    %12 = vector.broadcast %cst_9 : f32 to vector<8x8xf32>
    %13 = arith.select %11, %8, %12 : vector<8x8xi1>, vector<8x8xf32>
    %cst_10 = arith.constant dense<0xFF800000> : vector<8xf32>
    %14 = vector.multi_reduction <maximumf>, %13, %cst_10 [1] : vector<8x8xf32> to vector<8xf32>
    %15 = vector.shape_cast %14 : vector<8xf32> to vector<8x1xf32>
    %16 = vector.broadcast %15 : vector<8x1xf32> to vector<8x8xf32>
    %17 = arith.subf %13, %16 : vector<8x8xf32>
    %18 = math.exp %17 : vector<8x8xf32>
    %cst_11 = arith.constant dense<0.000000e+00> : vector<8xf32>
    %19 = vector.multi_reduction <add>, %18, %cst_11 [1] : vector<8x8xf32> to vector<8xf32>
    %20 = vector.shape_cast %19 : vector<8xf32> to vector<8x1xf32>
    %21 = vector.broadcast %20 : vector<8x1xf32> to vector<8x8xf32>
    %22 = arith.divf %18, %21 : vector<8x8xf32>
    %cst_12 = arith.constant dense<0.000000e+00> : vector<8x32xf32>
    %23 = tpu.matmul %22, %5, %cst_12 {dimension_numbers = #tpu.dot_dimension_numbers<[1], [0], [0], [1], [0, 0, 1, 1], [], []>} : vector<8x8xf32>, vector<8x32xf32>, vector<8x32xf32> -> vector<8x32xf32>
    %c0_13 = arith.constant 0 : index
    %c0_14 = arith.constant 0 : index
    %c0_15 = arith.constant 0 : index
    %24 = vector.load %arg4[%c0_13, %c0_14, %c0_15] : memref<1x8x32xf32, #tpu.memory_space<vmem>>, vector<1x8x32xf32>
    %25 = vector.shape_cast %24 : vector<1x8x32xf32> to vector<8x32xf32>
    %26 = vector.shape_cast %23 : vector<8x32xf32> to vector<1x8x32xf32>
    tpu.vector_store %arg4[%c0_13, %c0_14, %c0_15], %26 {strides = array<i32>} : memref<1x8x32xf32, #tpu.memory_space<vmem>>, vector<1x8x32xf32>,
    return
  }
  func.func @transform_0(%arg0: i32) -> (i32, i32, i32) {
    %c0_i32 = arith.constant 0 : i32
    %c0_i32_0 = arith.constant 0 : i32
    %c0_i32_1 = arith.constant 0 : i32
    return %arg0, %c0_i32, %c0_i32_0 : i32, i32, i32
  }
  func.func @transform_1(%arg0: i32) -> (i32, i32, i32) {
    %c0_i32 = arith.constant 0 : i32
    %c0_i32_0 = arith.constant 0 : i32
    %c0_i32_1 = arith.constant 0 : i32
    return %arg0, %c0_i32, %c0_i32_0 : i32, i32, i32
  }
  func.func @transform_2(%arg0: i32) -> (i32, i32, i32) {
    %c0_i32 = arith.constant 0 : i32
    %c0_i32_0 = arith.constant 0 : i32
    %c0_i32_1 = arith.constant 0 : i32
    return %arg0, %c0_i32, %c0_i32_0 : i32, i32, i32
  }
  func.func @transform_3(%arg0: i32) -> (i32, i32, i32) {
    %c0_i32 = arith.constant 0 : i32
    %c0_i32_0 = arith.constant 0 : i32
    %c0_i32_1 = arith.constant 0 : i32
    return %arg0, %c0_i32, %c0_i32_0 : i32, i32, i32
  }
}

module attributes {stable_mosaic.version = 11 : i64} {
  func.func @_linear_kernel(%arg0: i32, %arg1: memref<16x128xf32, #tpu.memory_space<vmem>>, %arg2: memref<128x32xf32, #tpu.memory_space<vmem>>, %arg3: memref<1x32xf32, #tpu.memory_space<vmem>>, %arg4: memref<16x32xf32, #tpu.memory_space<vmem>>) attributes {dimension_semantics = [#tpu.dimension_semantics<parallel>], iteration_bounds = array<i64: 1>, scalar_prefetch = 0 : i64, scratch_operands = 0 : i64, tpu.core_type = #tpu.core_type<tc>, window_params = [{transform_indices = @transform_0, window_bounds = array<i64: 16, 128>}, {pipeline_mode = #tpu.pipeline_mode<synchronous>, transform_indices = @transform_1, window_bounds = array<i64: 128, 32>}, {pipeline_mode = #tpu.pipeline_mode<synchronous>, transform_indices = @transform_2, window_bounds = array<i64: 1, 32>}, {transform_indices = @transform_3, window_bounds = array<i64: 16, 32>}]} {
    %c0 = arith.constant 0 : index
    %c0_0 = arith.constant 0 : index
    %0 = vector.load %arg1[%c0, %c0_0] : memref<16x128xf32, #tpu.memory_space<vmem>>, vector<16x128xf32>
    %c0_1 = arith.constant 0 : index
    %c0_2 = arith.constant 0 : index
    %1 = vector.load %arg2[%c0_1, %c0_2] : memref<128x32xf32, #tpu.memory_space<vmem>>, vector<128x32xf32>
    %cst = arith.constant dense<0.000000e+00> : vector<16x32xf32>
    %2 = tpu.matmul %0, %1, %cst {dimension_numbers = #tpu.dot_dimension_numbers<[1], [0], [0], [1], [0, 0, 1, 1], [], []>} : vector<16x128xf32>, vector<128x32xf32>, vector<16x32xf32> -> vector<16x32xf32>
    %c0_3 = arith.constant 0 : index
    %c0_4 = arith.constant 0 : index
    %3 = vector.load %arg3[%c0_3, %c0_4] : memref<1x32xf32, #tpu.memory_space<vmem>>, vector<1x32xf32>
    %4 = vector.broadcast %3 : vector<1x32xf32> to vector<16x32xf32>
    %5 = arith.addf %2, %4 : vector<16x32xf32>
    %c0_5 = arith.constant 0 : index
    %c0_6 = arith.constant 0 : index
    %6 = vector.load %arg4[%c0_5, %c0_6] : memref<16x32xf32, #tpu.memory_space<vmem>>, vector<16x32xf32>
    tpu.vector_store %arg4[%c0_5, %c0_6], %5 {strides = array<i32>} : memref<16x32xf32, #tpu.memory_space<vmem>>, vector<16x32xf32>,
    return
  }
  func.func @transform_0(%arg0: i32) -> (i32, i32) {
    %c0_i32 = arith.constant 0 : i32
    %c0_i32_0 = arith.constant 0 : i32
    return %arg0, %c0_i32 : i32, i32
  }
  func.func @transform_1(%arg0: i32) -> (i32, i32) {
    %c0_i32 = arith.constant 0 : i32
    %c0_i32_0 = arith.constant 0 : i32
    %c0_i32_1 = arith.constant 0 : i32
    return %c0_i32, %c0_i32_0 : i32, i32
  }
  func.func @transform_2(%arg0: i32) -> (i32, i32) {
    %c0_i32 = arith.constant 0 : i32
    %c0_i32_0 = arith.constant 0 : i32
    %c0_i32_1 = arith.constant 0 : i32
    return %c0_i32, %c0_i32_0 : i32, i32
  }
  func.func @transform_3(%arg0: i32) -> (i32, i32) {
    %c0_i32 = arith.constant 0 : i32
    %c0_i32_0 = arith.constant 0 : i32
    return %arg0, %c0_i32 : i32, i32
  }
}

module attributes {stable_mosaic.version = 11 : i64} {
  func.func @_add_ln_kernel(%arg0: i32, %arg1: memref<16x32xf32, #tpu.memory_space<vmem>>, %arg2: memref<16x32xf32, #tpu.memory_space<vmem>>, %arg3: memref<1x32xf32, #tpu.memory_space<vmem>>, %arg4: memref<1x32xf32, #tpu.memory_space<vmem>>, %arg5: memref<16x32xf32, #tpu.memory_space<vmem>>) attributes {dimension_semantics = [#tpu.dimension_semantics<parallel>], iteration_bounds = array<i64: 1>, scalar_prefetch = 0 : i64, scratch_operands = 0 : i64, tpu.core_type = #tpu.core_type<tc>, window_params = [{transform_indices = @transform_0, window_bounds = array<i64: 16, 32>}, {transform_indices = @transform_1, window_bounds = array<i64: 16, 32>}, {pipeline_mode = #tpu.pipeline_mode<synchronous>, transform_indices = @transform_2, window_bounds = array<i64: 1, 32>}, {pipeline_mode = #tpu.pipeline_mode<synchronous>, transform_indices = @transform_3, window_bounds = array<i64: 1, 32>}, {transform_indices = @transform_4, window_bounds = array<i64: 16, 32>}]} {
    %c0 = arith.constant 0 : index
    %c0_0 = arith.constant 0 : index
    %0 = vector.load %arg1[%c0, %c0_0] : memref<16x32xf32, #tpu.memory_space<vmem>>, vector<16x32xf32>
    %c0_1 = arith.constant 0 : index
    %c0_2 = arith.constant 0 : index
    %1 = vector.load %arg2[%c0_1, %c0_2] : memref<16x32xf32, #tpu.memory_space<vmem>>, vector<16x32xf32>
    %2 = arith.addf %0, %1 : vector<16x32xf32>
    %cst = arith.constant dense<0.000000e+00> : vector<16xf32>
    %3 = vector.multi_reduction <add>, %2, %cst [1] : vector<16x32xf32> to vector<16xf32>
    %4 = vector.shape_cast %3 : vector<16xf32> to vector<16x1xf32>
    %cst_3 = arith.constant 3.200000e+01 : f32
    %5 = vector.broadcast %cst_3 : f32 to vector<16x1xf32>
    %6 = arith.divf %4, %5 : vector<16x1xf32>
    %7 = vector.broadcast %6 : vector<16x1xf32> to vector<16x32xf32>
    %8 = arith.subf %2, %7 : vector<16x32xf32>
    %9 = arith.mulf %8, %8 : vector<16x32xf32>
    %cst_4 = arith.constant dense<0.000000e+00> : vector<16xf32>
    %10 = vector.multi_reduction <add>, %9, %cst_4 [1] : vector<16x32xf32> to vector<16xf32>
    %11 = vector.shape_cast %10 : vector<16xf32> to vector<16x1xf32>
    %cst_5 = arith.constant 3.200000e+01 : f32
    %12 = vector.broadcast %cst_5 : f32 to vector<16x1xf32>
    %13 = arith.divf %11, %12 : vector<16x1xf32>
    %cst_6 = arith.constant 9.99999974E-6 : f32
    %14 = vector.broadcast %cst_6 : f32 to vector<16x1xf32>
    %15 = arith.addf %13, %14 : vector<16x1xf32>
    %16 = math.rsqrt %15 : vector<16x1xf32>
    %17 = vector.broadcast %16 : vector<16x1xf32> to vector<16x32xf32>
    %18 = arith.mulf %8, %17 : vector<16x32xf32>
    %c0_7 = arith.constant 0 : index
    %c0_8 = arith.constant 0 : index
    %19 = vector.load %arg3[%c0_7, %c0_8] : memref<1x32xf32, #tpu.memory_space<vmem>>, vector<1x32xf32>
    %20 = vector.broadcast %19 : vector<1x32xf32> to vector<16x32xf32>
    %21 = arith.mulf %18, %20 : vector<16x32xf32>
    %c0_9 = arith.constant 0 : index
    %c0_10 = arith.constant 0 : index
    %22 = vector.load %arg4[%c0_9, %c0_10] : memref<1x32xf32, #tpu.memory_space<vmem>>, vector<1x32xf32>
    %23 = vector.broadcast %22 : vector<1x32xf32> to vector<16x32xf32>
    %24 = arith.addf %21, %23 : vector<16x32xf32>
    %c0_11 = arith.constant 0 : index
    %c0_12 = arith.constant 0 : index
    %25 = vector.load %arg5[%c0_11, %c0_12] : memref<16x32xf32, #tpu.memory_space<vmem>>, vector<16x32xf32>
    tpu.vector_store %arg5[%c0_11, %c0_12], %24 {strides = array<i32>} : memref<16x32xf32, #tpu.memory_space<vmem>>, vector<16x32xf32>,
    return
  }
  func.func @transform_0(%arg0: i32) -> (i32, i32) {
    %c0_i32 = arith.constant 0 : i32
    %c0_i32_0 = arith.constant 0 : i32
    return %arg0, %c0_i32 : i32, i32
  }
  func.func @transform_1(%arg0: i32) -> (i32, i32) {
    %c0_i32 = arith.constant 0 : i32
    %c0_i32_0 = arith.constant 0 : i32
    return %arg0, %c0_i32 : i32, i32
  }
  func.func @transform_2(%arg0: i32) -> (i32, i32) {
    %c0_i32 = arith.constant 0 : i32
    %c0_i32_0 = arith.constant 0 : i32
    %c0_i32_1 = arith.constant 0 : i32
    return %c0_i32, %c0_i32_0 : i32, i32
  }
  func.func @transform_3(%arg0: i32) -> (i32, i32) {
    %c0_i32 = arith.constant 0 : i32
    %c0_i32_0 = arith.constant 0 : i32
    %c0_i32_1 = arith.constant 0 : i32
    return %c0_i32, %c0_i32_0 : i32, i32
  }
  func.func @transform_4(%arg0: i32) -> (i32, i32) {
    %c0_i32 = arith.constant 0 : i32
    %c0_i32_0 = arith.constant 0 : i32
    return %arg0, %c0_i32 : i32, i32
  }
}

module attributes {stable_mosaic.version = 11 : i64} {
  func.func @_linear_kernel(%arg0: i32, %arg1: memref<16x32xf32, #tpu.memory_space<vmem>>, %arg2: memref<32x64xf32, #tpu.memory_space<vmem>>, %arg3: memref<1x64xf32, #tpu.memory_space<vmem>>, %arg4: memref<16x64xf32, #tpu.memory_space<vmem>>) attributes {dimension_semantics = [#tpu.dimension_semantics<parallel>], iteration_bounds = array<i64: 1>, scalar_prefetch = 0 : i64, scratch_operands = 0 : i64, tpu.core_type = #tpu.core_type<tc>, window_params = [{transform_indices = @transform_0, window_bounds = array<i64: 16, 32>}, {pipeline_mode = #tpu.pipeline_mode<synchronous>, transform_indices = @transform_1, window_bounds = array<i64: 32, 64>}, {pipeline_mode = #tpu.pipeline_mode<synchronous>, transform_indices = @transform_2, window_bounds = array<i64: 1, 64>}, {transform_indices = @transform_3, window_bounds = array<i64: 16, 64>}]} {
    %c0 = arith.constant 0 : index
    %c0_0 = arith.constant 0 : index
    %0 = vector.load %arg1[%c0, %c0_0] : memref<16x32xf32, #tpu.memory_space<vmem>>, vector<16x32xf32>
    %c0_1 = arith.constant 0 : index
    %c0_2 = arith.constant 0 : index
    %1 = vector.load %arg2[%c0_1, %c0_2] : memref<32x64xf32, #tpu.memory_space<vmem>>, vector<32x64xf32>
    %cst = arith.constant dense<0.000000e+00> : vector<16x64xf32>
    %2 = tpu.matmul %0, %1, %cst {dimension_numbers = #tpu.dot_dimension_numbers<[1], [0], [0], [1], [0, 0, 1, 1], [], []>} : vector<16x32xf32>, vector<32x64xf32>, vector<16x64xf32> -> vector<16x64xf32>
    %c0_3 = arith.constant 0 : index
    %c0_4 = arith.constant 0 : index
    %3 = vector.load %arg3[%c0_3, %c0_4] : memref<1x64xf32, #tpu.memory_space<vmem>>, vector<1x64xf32>
    %4 = vector.broadcast %3 : vector<1x64xf32> to vector<16x64xf32>
    %5 = arith.addf %2, %4 : vector<16x64xf32>
    %cst_5 = arith.constant 0.000000e+00 : f32
    %6 = vector.broadcast %cst_5 : f32 to vector<16x64xf32>
    %7 = arith.maximumf %5, %6 : vector<16x64xf32>
    %c0_6 = arith.constant 0 : index
    %c0_7 = arith.constant 0 : index
    %8 = vector.load %arg4[%c0_6, %c0_7] : memref<16x64xf32, #tpu.memory_space<vmem>>, vector<16x64xf32>
    tpu.vector_store %arg4[%c0_6, %c0_7], %7 {strides = array<i32>} : memref<16x64xf32, #tpu.memory_space<vmem>>, vector<16x64xf32>,
    return
  }
  func.func @transform_0(%arg0: i32) -> (i32, i32) {
    %c0_i32 = arith.constant 0 : i32
    %c0_i32_0 = arith.constant 0 : i32
    return %arg0, %c0_i32 : i32, i32
  }
  func.func @transform_1(%arg0: i32) -> (i32, i32) {
    %c0_i32 = arith.constant 0 : i32
    %c0_i32_0 = arith.constant 0 : i32
    %c0_i32_1 = arith.constant 0 : i32
    return %c0_i32, %c0_i32_0 : i32, i32
  }
  func.func @transform_2(%arg0: i32) -> (i32, i32) {
    %c0_i32 = arith.constant 0 : i32
    %c0_i32_0 = arith.constant 0 : i32
    %c0_i32_1 = arith.constant 0 : i32
    return %c0_i32, %c0_i32_0 : i32, i32
  }
  func.func @transform_3(%arg0: i32) -> (i32, i32) {
    %c0_i32 = arith.constant 0 : i32
    %c0_i32_0 = arith.constant 0 : i32
    return %arg0, %c0_i32 : i32, i32
  }
}

module attributes {stable_mosaic.version = 11 : i64} {
  func.func @_linear_kernel(%arg0: i32, %arg1: memref<16x64xf32, #tpu.memory_space<vmem>>, %arg2: memref<64x32xf32, #tpu.memory_space<vmem>>, %arg3: memref<1x32xf32, #tpu.memory_space<vmem>>, %arg4: memref<16x32xf32, #tpu.memory_space<vmem>>) attributes {dimension_semantics = [#tpu.dimension_semantics<parallel>], iteration_bounds = array<i64: 1>, scalar_prefetch = 0 : i64, scratch_operands = 0 : i64, tpu.core_type = #tpu.core_type<tc>, window_params = [{transform_indices = @transform_0, window_bounds = array<i64: 16, 64>}, {pipeline_mode = #tpu.pipeline_mode<synchronous>, transform_indices = @transform_1, window_bounds = array<i64: 64, 32>}, {pipeline_mode = #tpu.pipeline_mode<synchronous>, transform_indices = @transform_2, window_bounds = array<i64: 1, 32>}, {transform_indices = @transform_3, window_bounds = array<i64: 16, 32>}]} {
    %c0 = arith.constant 0 : index
    %c0_0 = arith.constant 0 : index
    %0 = vector.load %arg1[%c0, %c0_0] : memref<16x64xf32, #tpu.memory_space<vmem>>, vector<16x64xf32>
    %c0_1 = arith.constant 0 : index
    %c0_2 = arith.constant 0 : index
    %1 = vector.load %arg2[%c0_1, %c0_2] : memref<64x32xf32, #tpu.memory_space<vmem>>, vector<64x32xf32>
    %cst = arith.constant dense<0.000000e+00> : vector<16x32xf32>
    %2 = tpu.matmul %0, %1, %cst {dimension_numbers = #tpu.dot_dimension_numbers<[1], [0], [0], [1], [0, 0, 1, 1], [], []>} : vector<16x64xf32>, vector<64x32xf32>, vector<16x32xf32> -> vector<16x32xf32>
    %c0_3 = arith.constant 0 : index
    %c0_4 = arith.constant 0 : index
    %3 = vector.load %arg3[%c0_3, %c0_4] : memref<1x32xf32, #tpu.memory_space<vmem>>, vector<1x32xf32>
    %4 = vector.broadcast %3 : vector<1x32xf32> to vector<16x32xf32>
    %5 = arith.addf %2, %4 : vector<16x32xf32>
    %c0_5 = arith.constant 0 : index
    %c0_6 = arith.constant 0 : index
    %6 = vector.load %arg4[%c0_5, %c0_6] : memref<16x32xf32, #tpu.memory_space<vmem>>, vector<16x32xf32>
    tpu.vector_store %arg4[%c0_5, %c0_6], %5 {strides = array<i32>} : memref<16x32xf32, #tpu.memory_space<vmem>>, vector<16x32xf32>,
    return
  }
  func.func @transform_0(%arg0: i32) -> (i32, i32) {
    %c0_i32 = arith.constant 0 : i32
    %c0_i32_0 = arith.constant 0 : i32
    return %arg0, %c0_i32 : i32, i32
  }
  func.func @transform_1(%arg0: i32) -> (i32, i32) {
    %c0_i32 = arith.constant 0 : i32
    %c0_i32_0 = arith.constant 0 : i32
    %c0_i32_1 = arith.constant 0 : i32
    return %c0_i32, %c0_i32_0 : i32, i32
  }
  func.func @transform_2(%arg0: i32) -> (i32, i32) {
    %c0_i32 = arith.constant 0 : i32
    %c0_i32_0 = arith.constant 0 : i32
    %c0_i32_1 = arith.constant 0 : i32
    return %c0_i32, %c0_i32_0 : i32, i32
  }
  func.func @transform_3(%arg0: i32) -> (i32, i32) {
    %c0_i32 = arith.constant 0 : i32
    %c0_i32_0 = arith.constant 0 : i32
    return %arg0, %c0_i32 : i32, i32
  }
}

module attributes {stable_mosaic.version = 11 : i64} {
  func.func @_add_ln_kernel(%arg0: i32, %arg1: memref<16x32xf32, #tpu.memory_space<vmem>>, %arg2: memref<16x32xf32, #tpu.memory_space<vmem>>, %arg3: memref<1x32xf32, #tpu.memory_space<vmem>>, %arg4: memref<1x32xf32, #tpu.memory_space<vmem>>, %arg5: memref<16x32xf32, #tpu.memory_space<vmem>>) attributes {dimension_semantics = [#tpu.dimension_semantics<parallel>], iteration_bounds = array<i64: 1>, scalar_prefetch = 0 : i64, scratch_operands = 0 : i64, tpu.core_type = #tpu.core_type<tc>, window_params = [{transform_indices = @transform_0, window_bounds = array<i64: 16, 32>}, {transform_indices = @transform_1, window_bounds = array<i64: 16, 32>}, {pipeline_mode = #tpu.pipeline_mode<synchronous>, transform_indices = @transform_2, window_bounds = array<i64: 1, 32>}, {pipeline_mode = #tpu.pipeline_mode<synchronous>, transform_indices = @transform_3, window_bounds = array<i64: 1, 32>}, {transform_indices = @transform_4, window_bounds = array<i64: 16, 32>}]} {
    %c0 = arith.constant 0 : index
    %c0_0 = arith.constant 0 : index
    %0 = vector.load %arg1[%c0, %c0_0] : memref<16x32xf32, #tpu.memory_space<vmem>>, vector<16x32xf32>
    %c0_1 = arith.constant 0 : index
    %c0_2 = arith.constant 0 : index
    %1 = vector.load %arg2[%c0_1, %c0_2] : memref<16x32xf32, #tpu.memory_space<vmem>>, vector<16x32xf32>
    %2 = arith.addf %0, %1 : vector<16x32xf32>
    %cst = arith.constant dense<0.000000e+00> : vector<16xf32>
    %3 = vector.multi_reduction <add>, %2, %cst [1] : vector<16x32xf32> to vector<16xf32>
    %4 = vector.shape_cast %3 : vector<16xf32> to vector<16x1xf32>
    %cst_3 = arith.constant 3.200000e+01 : f32
    %5 = vector.broadcast %cst_3 : f32 to vector<16x1xf32>
    %6 = arith.divf %4, %5 : vector<16x1xf32>
    %7 = vector.broadcast %6 : vector<16x1xf32> to vector<16x32xf32>
    %8 = arith.subf %2, %7 : vector<16x32xf32>
    %9 = arith.mulf %8, %8 : vector<16x32xf32>
    %cst_4 = arith.constant dense<0.000000e+00> : vector<16xf32>
    %10 = vector.multi_reduction <add>, %9, %cst_4 [1] : vector<16x32xf32> to vector<16xf32>
    %11 = vector.shape_cast %10 : vector<16xf32> to vector<16x1xf32>
    %cst_5 = arith.constant 3.200000e+01 : f32
    %12 = vector.broadcast %cst_5 : f32 to vector<16x1xf32>
    %13 = arith.divf %11, %12 : vector<16x1xf32>
    %cst_6 = arith.constant 9.99999974E-6 : f32
    %14 = vector.broadcast %cst_6 : f32 to vector<16x1xf32>
    %15 = arith.addf %13, %14 : vector<16x1xf32>
    %16 = math.rsqrt %15 : vector<16x1xf32>
    %17 = vector.broadcast %16 : vector<16x1xf32> to vector<16x32xf32>
    %18 = arith.mulf %8, %17 : vector<16x32xf32>
    %c0_7 = arith.constant 0 : index
    %c0_8 = arith.constant 0 : index
    %19 = vector.load %arg3[%c0_7, %c0_8] : memref<1x32xf32, #tpu.memory_space<vmem>>, vector<1x32xf32>
    %20 = vector.broadcast %19 : vector<1x32xf32> to vector<16x32xf32>
    %21 = arith.mulf %18, %20 : vector<16x32xf32>
    %c0_9 = arith.constant 0 : index
    %c0_10 = arith.constant 0 : index
    %22 = vector.load %arg4[%c0_9, %c0_10] : memref<1x32xf32, #tpu.memory_space<vmem>>, vector<1x32xf32>
    %23 = vector.broadcast %22 : vector<1x32xf32> to vector<16x32xf32>
    %24 = arith.addf %21, %23 : vector<16x32xf32>
    %c0_11 = arith.constant 0 : index
    %c0_12 = arith.constant 0 : index
    %25 = vector.load %arg5[%c0_11, %c0_12] : memref<16x32xf32, #tpu.memory_space<vmem>>, vector<16x32xf32>
    tpu.vector_store %arg5[%c0_11, %c0_12], %24 {strides = array<i32>} : memref<16x32xf32, #tpu.memory_space<vmem>>, vector<16x32xf32>,
    return
  }
  func.func @transform_0(%arg0: i32) -> (i32, i32) {
    %c0_i32 = arith.constant 0 : i32
    %c0_i32_0 = arith.constant 0 : i32
    return %arg0, %c0_i32 : i32, i32
  }
  func.func @transform_1(%arg0: i32) -> (i32, i32) {
    %c0_i32 = arith.constant 0 : i32
    %c0_i32_0 = arith.constant 0 : i32
    return %arg0, %c0_i32 : i32, i32
  }
  func.func @transform_2(%arg0: i32) -> (i32, i32) {
    %c0_i32 = arith.constant 0 : i32
    %c0_i32_0 = arith.constant 0 : i32
    %c0_i32_1 = arith.constant 0 : i32
    return %c0_i32, %c0_i32_0 : i32, i32
  }
  func.func @transform_3(%arg0: i32) -> (i32, i32) {
    %c0_i32 = arith.constant 0 : i32
    %c0_i32_0 = arith.constant 0 : i32
    %c0_i32_1 = arith.constant 0 : i32
    return %c0_i32, %c0_i32_0 : i32, i32
  }
  func.func @transform_4(%arg0: i32) -> (i32, i32) {
    %c0_i32 = arith.constant 0 : i32
    %c0_i32_0 = arith.constant 0 : i32
    return %arg0, %c0_i32 : i32, i32
  }
}

</mosaic_0001>

<bundles_post_ra>
// kernel: transformer_forward.15
= control target key start
LH: loop header
LB: loop body
LE: loop exit
PB: predicated region body
PF: predicated region fallthrough
CT: control target
= control target key end

     0   :  { %s525_s15 = smov 0   ;;  %s527_s16 = smov 0   ;;  %s576_s0 = inlined_call_operand.vmem [shape: f32[2,8,32], index: 0, kind: input, shape index: {}]   ;;  %s577_s1 = inlined_call_operand.vmem [shape: f32[32,32], index: 1, kind: input, shape index: {}]   ;;  %s578_s2 = inlined_call_operand.vmem [shape: f32[1,32], index: 2, kind: input, shape index: {}]   ;;  %s579_s3 = inlined_call_operand.vmem [shape: f32[1,3000,32], index: 3, kind: input, shape index: {}]   ;;  %s580_s4 = inlined_call_operand.vmem [shape: f32[2,8,32], index: 4, kind: output, shape index: {}]  }
   0x1   :  { %s529_s17 = smov 0  }
   0x2 LB: > { %s26_s18 = sadd.s32 1, %s492_s16  ;;  %p425_p0 = scmp.ge.s32.totalorder %s496_s17, 1  ;;  %s496_s17 = sphi %s529_s17, %s14_s17   ;;  %s492_s16 = sphi %s527_s16, %s582_s16   ;;  %s488_s15 = sphi %s525_s15, %s581_s15  }
   0x3   : > { %p28_p1 = scmp.ge.s32.totalorder %s26_s18, 2  ;;  %p189_p2 = scmp.lt.s32.totalorder %s496_s17, 3 }
   0x5   : > { %s584_s18 = smov (%p28_p1, %s26_s18), 0  ;;  %p190_p3 = pnand %p425_p0, %p189_p2 }
   0x6   : > { %p223_p4 = scmp.lt.s32.totalorder (!%p190_p3), %s488_s15, 1 }
   0x7   : > { %193 = sbr.rel (%p190_p3) target bundleno = 219 (0xdb), region = 36 }
   0xc   : > { %v245_v0 = vld [vmem:[%s577_s1 + $0x18] sm:$0xff]  ;;  %v498_v1 = vmov 0.0   ;;  %v244_v2 = vld [vmem:[%s577_s1 + $0x10] sm:$0xff]  ;;  %vm499_vm0 = vmmov 0   ;;  %s586_s15 = smov (!%p223_p4, %s488_s15), 1  ;;  %v243_v3 = vld [vmem:[%s577_s1 + $0x8] sm:$0xff] }
   0xd   : > { %437 = vmatprep.subr.mxu0 %v498_v1  ;;  %445 = vmatprep.mubr.msk.f32.mxu0 %vm499_vm0, %v498_v1  ;;  %s426_s25 = sshll.u32 %s586_s15, 3  ;;  %v242_v4 = vld [vmem:[%s577_s1] sm:$0xff]  ;;  %vm253_vm1 = vcmask 261120  }
   0xe   : > { %438 = vmatpush3.msra.mxu0 %v245_v0  ;;  %s229_s30 = scalar_lea.vmem %s576_s0, %s426_s25  ;;  %v428_v6 = vld [vmem:[%s578_s2] ss:$0 sm:$0xff]  ;;  %s240_s11 = scalar_lea.vmem %s580_s4, %s426_s25 }
   0xf   : > { %439 = vmatprep.subr.mxu0 %v498_v1  ;;  %v241_v5 = vld [vmem:[%s229_s30] sm:$0xff] }
  0x10   : > { %440 = vmatpush3.msra.mxu0 %v244_v2  ;;  %v327_v8 = vld [vmem:[%s579_s3] sm:$0xff] }
  0x11   : > { %441 = vmatprep.subr.mxu0 %v498_v1 }
  0x12   : > { %442 = vmatpush3.msra.mxu0 %v243_v3 }
  0x13   : > { %443 = vmatprep.subr.mxu0 %v498_v1 }
  0x14   : > { %444 = vmatpush3.msra.mxu0 %v242_v4 }
  0x15   : > { %446 = vmatmul.mubr.msk.f32.vlgmr.msra.gmra.mxu0 %vm253_vm1, %v241_v5 }
  0xd5   : > { %v323_v7 = vpop.f32.mrf.mxu0 }
  0xd6   : > { %v324_v9 = vadd.f32 %v428_v6, %v323_v7 }
  0xd7   : > { %v447_v10 = vpop.f32.mrf.mxu0 }
  0xd8   : > { %v328_v11 = vadd.f32 %v327_v8, %v324_v9 }
  0xda   : > { %329 = vst.msk [vmem:[%s240_s11] sm:$0xff] %vm253_vm1, %v328_v11 }
  0xdb PF: > { %s14_s17 = sadd.s32 1, %s496_s17   ;;  %s581_s15 = smov %s492_s16 }
  0xdc   : > { %p11_p5 = scmp.ge.s32.totalorder %s14_s17, 4   ;;  %s582_s16 = smov %s584_s18 }
  0xde   :  { %13 = sbr.rel (!%p11_p5) target bundleno = 2 (0x2), region = 69 }

// kernel: transformer_forward.16
= control target key start
LH: loop header
LB: loop body
LE: loop exit
PB: predicated region body
PF: predicated region fallthrough
CT: control target
= control target key end

     0   :  { %v236_v3 = vmov 0.0   ;;  %vm45_vm0 = vcmask 261120   ;;  %v30_v15 = vlaneseq  ;;  %s320_s1 = inlined_call_operand.vmem [shape: f32[32,384], index: 1, kind: input, shape index: {}]   ;;  %s321_s0 = inlined_call_operand.vmem [shape: f32[16,32], index: 0, kind: input, shape index: {}]   ;;  %s322_s2 = inlined_call_operand.vmem [shape: f32[1,384], index: 2, kind: input, shape index: {}]   ;;  %s323_s3 = inlined_call_operand.vmem [shape: f32[16,384], index: 3, kind: output, shape index: {}]  }
   0x1   :  { %v26_v0 = vld [vmem:[%s320_s1 + $0x50] sm:$0xff]  ;;  %v25_v1 = vld [vmem:[%s320_s1 + $0x48] sm:$0xff]  ;;  %v23_v2 = vld [vmem:[%s320_s1 + $0x38] sm:$0xff]  ;;  %116 = vmatprep.mubr.f32.mxu0 %v236_v3 }
   0x2   :  { %76 = vmatprep.subr.mxu0 %v26_v0  ;;  %v27_v4 = vld [vmem:[%s320_s1 + $0x58] sm:$0xff]  ;;  %v22_v5 = vld [vmem:[%s320_s1 + $0x30] sm:$0xff]  ;;  %v20_v6 = vld [vmem:[%s320_s1 + $0x20] sm:$0xff]  ;;  %v31_v16 = vshrl.u32 %v30_v15, 7 }
   0x3   :  { %77 = vmatpush1.msra.mxu0 %v25_v1  ;;  %224 = vmatprep.subr.mxu1 %v27_v4  ;;  %v24_v7 = vld [vmem:[%s320_s1 + $0x40] sm:$0xff]  ;;  %v19_v8 = vld [vmem:[%s320_s1 + $0x18] sm:$0xff]  ;;  %v21_v9 = vld [vmem:[%s320_s1 + $0x28] sm:$0xff] }
   0x4   :  { %78 = vmatprep.subr.mxu0 %v23_v2  ;;  %225 = vmatpush3.msra.mxu1 %v27_v4  ;;  %v17_v10 = vld [vmem:[%s320_s1 + $0x8] sm:$0xff]  ;;  %v16_v11 = vld [vmem:[%s320_s1] sm:$0xff]  ;;  %v18_v12 = vld [vmem:[%s320_s1 + $0x10] sm:$0xff]  ;;  %v32_v17 = vsub.s32 0, %v31_v16  ;;  %v36_v19 = vsub.s32 1, %v31_v16  ;;  %v40_v20 = vsub.s32 2, %v31_v16 }
   0x5   :  { %79 = vmatpush1.msra.mxu0 %v22_v5  ;;  %226 = vmatprep.subr.mxu1 %v24_v7  ;;  %v14_v13 = vld [vmem:[%s321_s0] sm:$0xff]  ;;  %v15_v14 = vld [vmem:[%s321_s0 + $0x8] sm:$0xff] }
   0x6   :  { %80 = vmatprep.subr.mxu0 %v20_v6  ;;  %227 = vmatpush3.msra.mxu1 %v24_v7  ;;  %v28_v18 = vld [vmem:[%s322_s2] sm:$0x7] }
   0x7   :  { %81 = vmatpush1.msra.mxu0 %v19_v8  ;;  %228 = vmatprep.subr.mxu1 %v21_v9  ;;  %v33_v21 = vrot.slane %v28_v18, %v32_v17  ;;  %v37_v22 = vrot.slane %v28_v18, %v36_v19  ;;  %v41_v23 = vrot.slane %v28_v18, %v40_v20 }
   0x8   :  { %82 = vmatprep.subr.mxu0 %v17_v10  ;;  %229 = vmatpush3.msra.mxu1 %v21_v9 }
   0x9   :  { %83 = vmatpush1.msra.mxu0 %v16_v11  ;;  %230 = vmatprep.subr.mxu1 %v18_v12 }
   0xa   :  { %214 = vmatmul.mubr.msk.f32.vlgmr.msra.gmra.mxu0 %vm45_vm0, %v14_v13  ;;  %231 = vmatpush3.msra.mxu1 %v18_v12 }
   0xb   :  { %232 = vmatprep.mubr.msk.f32.mxu1 %vm45_vm0, %v14_v13  ;;  %122 = vmatprep.mubr.f32.mxu0 %v236_v3 }
   0xc   :  { %233 = vmatmul.mubr.msk.f32.vlgmr.msra.gmra.mxu1 %vm45_vm0, %v15_v14 }
   0xe   :  { %215 = vmatmul.mubr.msk.f32.gmra.mxu0 %vm45_vm0, %v15_v14 }
  0xca   :  { %v118_v24 = vpop.f32.mrf.mxu0 }
  0xcb   :  { %v119_v25 = vadd.f32 %v118_v24, %v33_v21 }
  0xcc   :  { %v120_v26 = vpop.f32.mrf.mxu0  ;;  %v234_v27 = vpop.f32.mrf.mxu1 }
  0xcd   :  { %204 = vst [vmem:[%s323_s3] sm:$0xff] %v119_v25  ;;  %v121_v28 = vadd.f32 %v120_v26, %v37_v22  ;;  %v201_v29 = vadd.f32 %v234_v27, %v41_v23 }
  0xce   :  { %v124_v30 = vpop.f32.mrf.mxu0  ;;  %v195_v31 = vpop.f32.mrf.mxu1 }
  0xcf   :  { %205 = vst [vmem:[%s323_s3 + $0x8] sm:$0xff] %v121_v28  ;;  %209 = vst [vmem:[%s323_s3 + $0x28] sm:$0xff] %v201_v29  ;;  %v125_v32 = vadd.f32 %v124_v30, %v33_v21  ;;  %v196_v33 = vadd.f32 %v195_v31, %v41_v23 }
  0xd0   :  { %v126_v34 = vpop.f32.mrf.mxu0 }
  0xd1   :  { %207 = vst [vmem:[%s323_s3 + $0x18] sm:$0xff] %v125_v32  ;;  %206 = vst [vmem:[%s323_s3 + $0x10] sm:$0xff] %v196_v33  ;;  %v127_v35 = vadd.f32 %v126_v34, %v37_v22 }
  0xd3   :  { %208 = vst [vmem:[%s323_s3 + $0x20] sm:$0xff] %v127_v35 }

// kernel: transformer_forward.17
= control target key start
LH: loop header
LB: loop body
LE: loop exit
PB: predicated region body
PF: predicated region fallthrough
CT: control target
= control target key end

     0   :  { %s522_s12 = smov 0   ;;  %s557_s0 = inlined_call_operand.vmem [shape: f32[8,8,32], index: 0, kind: input, shape index: {}]   ;;  %s558_s1 = inlined_call_operand.vmem [shape: f32[8,8,32], index: 1, kind: input, shape index: {}]   ;;  %s559_s2 = inlined_call_operand.vmem [shape: f32[8,8,32], index: 2, kind: input, shape index: {}]   ;;  %s560_s3 = inlined_call_operand.vmem [shape: f32[8,8,32], index: 3, kind: output, shape index: {}]  }
   0x1 LB: > { %s450_s13 = sadd.s32 4294967295, %s498_s12   ;;  %p454_p0 = scmp.ge.s32.totalorder %s498_s12, 1  ;;  %s498_s12 = sphi %s522_s12, %s13_s12  }
   0x2   : > { %p154_p1 = scmp.lt.s32.totalorder %s498_s12, 9 }
   0x4   : > { %p155_p2 = pnand %p454_p0, %p154_p1 }
   0x5   : > { %p184_p3 = scmp.lt.s32.totalorder (!%p155_p2), %s450_s13, 7 }
   0x6   : > { %158 = sbr.rel (%p155_p2) target bundleno = 721 (0x2d1), region = 32 }
   0xb   : > { %v500_v0 = vmov 0.0   ;;  %vm501_vm0 = vmmov 0   ;;  %s562_s13 = smov (!%p184_p3, %s450_s13), 7  ;;  %vm203_vm1 = vcmask 261120   ;;  %v281_v3 = vlaneseq }
   0xc   : > { %468 = vmatprep.subr.mxu0 %v500_v0  ;;  %470 = vmatprep.mubr.msk.f32.mxu0 %vm501_vm0, %v500_v0  ;;  %s530_s14 = sshll.u32 %s562_s13, 3  ;;  %vm287_vm3 = vcmask 64512  }
   0xd   : > { %473 = vmatprep.subr.mxu1 %v500_v0  ;;  %475 = vmatprep.mubr.msk.f32.mxu1 %vm501_vm0, %v500_v0  ;;  %s191_s17 = scalar_lea.vmem %s558_s1, %s530_s14  ;;  %s187_s20 = scalar_lea.vmem %s557_s0, %s530_s14  ;;  %v282_v4 = vshrl.u32 %v281_v3, 7  ;;  %v284_v5 = vand.u32 127, %v281_v3 }
   0xe   : > { %v201_v1 = vld [vmem:[%s191_s17] sm:$0xff]  ;;  %s195_s23 = scalar_lea.vmem %s559_s2, %s530_s14  ;;  %s199_s26 = scalar_lea.vmem %s560_s3, %s530_s14 }
   0xf   : > { %469 = vmatpush3.xpose.msk.msra.mxu0 %vm203_vm1, %v201_v1  ;;  %v200_v2 = vld [vmem:[%s187_s20] sm:$0xff]  ;;  %vm285_vm2 = vcmp.ge.s32.totalorder %v282_v4, %v284_v5 }
  0x10   : > { %v202_v16 = vld [vmem:[%s195_s23] sm:$0xff] }
  0x11   : > { %474 = vmatpush3.msra.mxu1 %v202_v16 }
  0x12   : > { %471 = vmatmul.mubr.msk.f32.vlgmr.msra.gmra.mxu0 %vm203_vm1, %v200_v2 }
  0xd2   : > { %v276_v6 = vpop.f32.mrf.mxu0 }
  0xd3   : > { %v280_v7 = vmul.f32 0.03125, %v276_v6 }
  0xd4   : > { %v472_v8 = vpop.f32.mrf.mxu0 }
  0xd5   : > { %v286_v9 = vsel %vm285_vm2, %v280_v7, -inf }
  0xd6   : > { %v288_v10 = vsel %vm287_vm3, %v286_v9, -inf }
  0xd7   : > { %289 = vmax.xlane.f32.xlu0 %v288_v10 }
 0x160   : > { %v290_v11 = vpop.xlane.xlu0 %289 }
 0x161   : > { %v291_v12 = vsub.f32 %v286_v9, %v290_v11 }
 0x163   : > { %v292_v13 = vmul.f32 1.442695, %v291_v12 }
 0x165   : > { %488 = vpow2.f32 %v292_v13 }
 0x172   : > { %v489_v14 = vpop.eup %488 }
 0x173   : > { %v294_v15 = vsel %vm287_vm3, %v489_v14, 0.0 }
 0x174   : > { %295 = vadd.xlane.f32.xlu0 %v294_v15 }
 0x1fd   : > { %v296_v17 = vpop.xlane.xlu0 %295 }
 0x1fe   : > { %490 = vrcp.f32 %v296_v17 }
 0x20b   : > { %v491_v18 = vpop.eup %490 }
 0x20c   : > { %v298_v19 = vmul.f32 %v491_v18, %v489_v14 }
 0x20e   : > { %476 = vmatmul.mubr.msk.f32.vlgmr.msra.gmra.mxu1 %vm287_vm3, %v298_v19 }
 0x2ce   : > { %v368_v20 = vpop.f32.mrf.mxu1 }
 0x2cf   : > { %372 = vst.msk [vmem:[%s199_s26] sm:$0xff] %vm203_vm1, %v368_v20 }
 0x2d0   : > { %v477_v21 = vpop.f32.mrf.mxu1 }
 0x2d1 PF: > { %s13_s12 = sadd.s32 1, %s498_s12  }
 0x2d2   : > { %p10_p4 = scmp.ge.s32.totalorder %s13_s12, 10  }
 0x2d4   :  { %12 = sbr.rel (!%p10_p4) target bundleno = 1 (0x1), region = 68 }

// kernel: transformer_forward.18
= control target key start
LH: loop header
LB: loop body
LE: loop exit
PB: predicated region body
PF: predicated region fallthrough
CT: control target
= control target key end

     0   :  { %vm114_vm0 = vcmask 261120   ;;  %s258_s1 = inlined_call_operand.vmem [shape: f32[128,32], index: 1, kind: input, shape index: {}]   ;;  %s259_s0 = inlined_call_operand.vmem [shape: f32[16,128], index: 0, kind: input, shape index: {}]   ;;  %s260_s2 = inlined_call_operand.vmem [shape: f32[1,32], index: 2, kind: input, shape index: {}]   ;;  %s261_s3 = inlined_call_operand.vmem [shape: f32[16,32], index: 3, kind: output, shape index: {}]  }
   0x1   :  { %v31_v0 = vld [vmem:[%s258_s1 + $0x78] sm:$0xff]  ;;  %v30_v1 = vld [vmem:[%s258_s1 + $0x70] sm:$0xff]  ;;  %v29_v2 = vld [vmem:[%s258_s1 + $0x68] sm:$0xff] }
   0x2   :  { %140 = vmatprep.subr.mxu0 %v31_v0  ;;  %v28_v3 = vld [vmem:[%s258_s1 + $0x60] sm:$0xff]  ;;  %v27_v5 = vld [vmem:[%s258_s1 + $0x58] sm:$0xff]  ;;  %v26_v6 = vld [vmem:[%s258_s1 + $0x50] sm:$0xff] }
   0x3   :  { %141 = vmatpush3.msra.mxu0 %v31_v0  ;;  %v14_v4 = vld [vmem:[%s259_s0] sm:$0xff]  ;;  %v25_v7 = vld [vmem:[%s258_s1 + $0x48] sm:$0xff]  ;;  %v23_v9 = vld [vmem:[%s258_s1 + $0x38] sm:$0xff] }
   0x4   :  { %142 = vmatprep.subr.mxu0 %v30_v1  ;;  %172 = vmatprep.mubr.f32.mxu0 %v14_v4  ;;  %v24_v8 = vld [vmem:[%s258_s1 + $0x40] sm:$0xff]  ;;  %v22_v10 = vld [vmem:[%s258_s1 + $0x30] sm:$0xff]  ;;  %v21_v11 = vld [vmem:[%s258_s1 + $0x28] sm:$0xff] }
   0x5   :  { %143 = vmatpush3.msra.mxu0 %v30_v1  ;;  %v20_v12 = vld [vmem:[%s258_s1 + $0x20] sm:$0xff]  ;;  %v19_v13 = vld [vmem:[%s258_s1 + $0x18] sm:$0xff]  ;;  %v18_v14 = vld [vmem:[%s258_s1 + $0x10] sm:$0xff] }
   0x6   :  { %144 = vmatprep.subr.mxu0 %v29_v2  ;;  %v17_v15 = vld [vmem:[%s258_s1 + $0x8] sm:$0xff]  ;;  %v16_v16 = vld [vmem:[%s258_s1] sm:$0xff] }
   0x7   :  { %145 = vmatpush3.msra.mxu0 %v29_v2  ;;  %v15_v17 = vld [vmem:[%s259_s0 + $0x8] sm:$0xff]  ;;  %v121_v18 = vld [vmem:[%s260_s2] ss:$0 sm:$0xff] }
   0x8   :  { %146 = vmatprep.subr.mxu0 %v28_v3 }
   0x9   :  { %147 = vmatpush3.msra.mxu0 %v28_v3 }
   0xa   :  { %148 = vmatprep.subr.mxu0 %v27_v5 }
   0xb   :  { %149 = vmatpush3.msra.mxu0 %v27_v5 }
   0xc   :  { %150 = vmatprep.subr.mxu0 %v26_v6 }
   0xd   :  { %151 = vmatpush3.msra.mxu0 %v26_v6 }
   0xe   :  { %152 = vmatprep.subr.mxu0 %v25_v7 }
   0xf   :  { %153 = vmatpush3.msra.mxu0 %v25_v7 }
  0x10   :  { %154 = vmatprep.subr.mxu0 %v24_v8 }
  0x11   :  { %155 = vmatpush3.msra.mxu0 %v24_v8 }
  0x12   :  { %156 = vmatprep.subr.mxu0 %v23_v9 }
  0x13   :  { %157 = vmatpush3.msra.mxu0 %v23_v9 }
  0x14   :  { %158 = vmatprep.subr.mxu0 %v22_v10 }
  0x15   :  { %159 = vmatpush3.msra.mxu0 %v22_v10 }
  0x16   :  { %160 = vmatprep.subr.mxu0 %v21_v11 }
  0x17   :  { %161 = vmatpush3.msra.mxu0 %v21_v11 }
  0x18   :  { %162 = vmatprep.subr.mxu0 %v20_v12 }
  0x19   :  { %163 = vmatpush3.msra.mxu0 %v20_v12 }
  0x1a   :  { %164 = vmatprep.subr.mxu0 %v19_v13 }
  0x1b   :  { %165 = vmatpush3.msra.mxu0 %v19_v13 }
  0x1c   :  { %166 = vmatprep.subr.mxu0 %v18_v14 }
  0x1d   :  { %167 = vmatpush3.msra.mxu0 %v18_v14 }
  0x1e   :  { %168 = vmatprep.subr.mxu0 %v17_v15 }
  0x1f   :  { %169 = vmatpush3.msra.mxu0 %v17_v15 }
  0x20   :  { %170 = vmatprep.subr.mxu0 %v16_v16 }
  0x21   :  { %171 = vmatpush3.msra.mxu0 %v16_v16 }
  0x22   :  { %173 = vmatmul.mubr.f32.vlgmr.msra.gmra.mxu0 %v15_v17 }
  0xe2   :  { %v174_v19 = vpop.f32.mrf.mxu0 }
  0xe3   :  { %v111_v20 = vadd.f32 %v174_v19, %v121_v18 }
  0xe4   :  { %v105_v21 = vpop.f32.mrf.mxu0 }
  0xe5   :  { %116 = vst.msk [vmem:[%s261_s3 + $0x8] sm:$0xff] %vm114_vm0, %v111_v20  ;;  %v106_v22 = vadd.f32 %v121_v18, %v105_v21 }
  0xe7   :  { %115 = vst.msk [vmem:[%s261_s3] sm:$0xff] %vm114_vm0, %v106_v22 }

// kernel: transformer_forward.19
= control target key start
LH: loop header
LB: loop body
LE: loop exit
PB: predicated region body
PF: predicated region fallthrough
CT: control target
= control target key end

     0   :  { %vm23_vm0 = vcmask 261120   ;;  %s136_s0 = inlined_call_operand.vmem [shape: f32[16,32], index: 0, kind: input, shape index: {}]   ;;  %s137_s1 = inlined_call_operand.vmem [shape: f32[16,32], index: 1, kind: input, shape index: {}]   ;;  %s138_s2 = inlined_call_operand.vmem [shape: f32[1,32], index: 2, kind: input, shape index: {}]   ;;  %s139_s3 = inlined_call_operand.vmem [shape: f32[1,32], index: 3, kind: input, shape index: {}]   ;;  %s140_s4 = inlined_call_operand.vmem [shape: f32[16,32], index: 4, kind: output, shape index: {}]  }
   0x1   :  { %v17_v0 = vld [vmem:[%s136_s0] sm:$0xff]  ;;  %v18_v2 = vld [vmem:[%s136_s0 + $0x8] sm:$0xff] }
   0x2   :  { %v19_v1 = vld [vmem:[%s137_s1] sm:$0xff]  ;;  %v20_v4 = vld [vmem:[%s137_s1 + $0x8] sm:$0xff] }
   0x3   :  { %v21_v3 = vadd.f32 %v19_v1, %v17_v0  ;;  %v22_v5 = vadd.f32 %v20_v4, %v18_v2  ;;  %v75_v25 = vld [vmem:[%s138_s2] ss:$0 sm:$0xff] }
   0x4   :  { %v76_v27 = vld [vmem:[%s139_s3] ss:$0 sm:$0xff] }
   0x5   :  { %v24_v6 = vsel %vm23_vm0, %v21_v3, 0.0  ;;  %v27_v7 = vsel %vm23_vm0, %v22_v5, 0.0 }
   0x6   :  { %25 = vadd.xlane.f32.xlu0 %v24_v6 }
   0xa   :  { %28 = vadd.xlane.f32.xlu0 %v27_v7 }
  0x8f   :  { %v26_v8 = vpop.xlane.xlu0 %25 }
  0x90   :  { %v31_v9 = vmul.f32 0.03125, %v26_v8 }
  0x92   :  { %v33_v10 = vsub.f32 %v21_v3, %v31_v9 }
  0x93   :  { %v29_v11 = vpop.xlane.xlu0 %28 }
  0x94   :  { %v32_v12 = vmul.f32 0.03125, %v29_v11  ;;  %v35_v13 = vmul.f32 %v33_v10, %v33_v10 }
  0x96   :  { %v34_v14 = vsub.f32 %v22_v5, %v32_v12  ;;  %v37_v15 = vsel %vm23_vm0, %v35_v13, 0.0 }
  0x97   :  { %38 = vadd.xlane.f32.xlu1 %v37_v15 }
  0x98   :  { %v36_v16 = vmul.f32 %v34_v14, %v34_v14 }
  0x9a   :  { %v40_v17 = vsel %vm23_vm0, %v36_v16, 0.0 }
  0x9b   :  { %41 = vadd.xlane.f32.xlu1 %v40_v17 }
 0x120   :  { %v39_v18 = vpop.xlane.xlu1 %38 }
 0x121   :  { %v43_v19 = vmul.f32 0.03125, %v39_v18 }
 0x123   :  { %v45_v20 = vadd.f32 1e-05, %v43_v19 }
 0x124   :  { %v42_v21 = vpop.xlane.xlu1 %41 }
 0x125   :  { %77 = vrsqrt.f32 %v45_v20  ;;  %v44_v22 = vmul.f32 0.03125, %v42_v21 }
 0x127   :  { %v46_v23 = vadd.f32 1e-05, %v44_v22 }
 0x129   :  { %79 = vrsqrt.f32 %v46_v23 }
 0x132   :  { %v78_v24 = vpop.eup %77 }
 0x133   :  { %v49_v26 = vmul.f32 %v78_v24, %v33_v10 }
 0x135   :  { %v58_v28 = vmul.f32 %v75_v25, %v49_v26 }
 0x136   :  { %v80_v29 = vpop.eup %79 }
 0x137   :  { %v67_v30 = vadd.f32 %v76_v27, %v58_v28  ;;  %v50_v31 = vmul.f32 %v80_v29, %v34_v14 }
 0x139   :  { %69 = vst.msk [vmem:[%s140_s4] sm:$0xff] %vm23_vm0, %v67_v30  ;;  %v59_v32 = vmul.f32 %v75_v25, %v50_v31 }
 0x13b   :  { %v68_v33 = vadd.f32 %v76_v27, %v59_v32 }
 0x13d   :  { %70 = vst.msk [vmem:[%s140_s4 + $0x8] sm:$0xff] %vm23_vm0, %v68_v33 }

// kernel: transformer_forward.20
= control target key start
LH: loop header
LB: loop body
LE: loop exit
PB: predicated region body
PF: predicated region fallthrough
CT: control target
= control target key end

     0   :  { %vm27_vm0 = vcmask 261120   ;;  %vm111_vm1 = vcmask 523264   ;;  %s187_s1 = inlined_call_operand.vmem [shape: f32[32,64], index: 1, kind: input, shape index: {}]   ;;  %s188_s0 = inlined_call_operand.vmem [shape: f32[16,32], index: 0, kind: input, shape index: {}]   ;;  %s189_s2 = inlined_call_operand.vmem [shape: f32[1,64], index: 2, kind: input, shape index: {}]   ;;  %s190_s3 = inlined_call_operand.vmem [shape: f32[16,64], index: 3, kind: output, shape index: {}]  }
   0x1   :  { %v19_v0 = vld [vmem:[%s187_s1 + $0x18] sm:$0xff]  ;;  %v18_v1 = vld [vmem:[%s187_s1 + $0x10] sm:$0xff]  ;;  %v14_v2 = vld [vmem:[%s188_s0] sm:$0xff] }
   0x2   :  { %127 = vmatprep.subr.mxu0 %v19_v0  ;;  %v17_v3 = vld [vmem:[%s187_s1 + $0x8] sm:$0xff]  ;;  %135 = vmatprep.mubr.msk.f32.mxu0 %vm27_vm0, %v14_v2  ;;  %v16_v4 = vld [vmem:[%s187_s1] sm:$0xff] }
   0x3   :  { %128 = vmatpush3.msra.mxu0 %v19_v0  ;;  %v15_v5 = vld [vmem:[%s188_s0 + $0x8] sm:$0xff]  ;;  %v118_v6 = vld [vmem:[%s189_s2] ss:$0 sm:$0xff] }
   0x4   :  { %129 = vmatprep.subr.mxu0 %v18_v1 }
   0x5   :  { %130 = vmatpush3.msra.mxu0 %v18_v1 }
   0x6   :  { %131 = vmatprep.subr.mxu0 %v17_v3 }
   0x7   :  { %132 = vmatpush3.msra.mxu0 %v17_v3 }
   0x8   :  { %133 = vmatprep.subr.mxu0 %v16_v4 }
   0x9   :  { %134 = vmatpush3.msra.mxu0 %v16_v4 }
   0xa   :  { %136 = vmatmul.mubr.msk.f32.vlgmr.msra.gmra.mxu0 %vm27_vm0, %v15_v5 }
  0xca   :  { %v137_v7 = vpop.f32.mrf.mxu0 }
  0xcb   :  { %v106_v8 = vadd.f32 %v137_v7, %v118_v6 }
  0xcc   :  { %v100_v9 = vpop.f32.mrf.mxu0 }
  0xcd   :  { %v110_v10 = vmax.f32 %v106_v8, 0.0  ;;  %v101_v11 = vadd.f32 %v118_v6, %v100_v9 }
  0xcf   :  { %113 = vst.msk [vmem:[%s190_s3 + $0x8] sm:$0xff] %vm111_vm1, %v110_v10  ;;  %v109_v12 = vmax.f32 %v101_v11, 0.0 }
  0xd1   :  { %112 = vst.msk [vmem:[%s190_s3] sm:$0xff] %vm111_vm1, %v109_v12 }

// kernel: transformer_forward.21
= control target key start
LH: loop header
LB: loop body
LE: loop exit
PB: predicated region body
PF: predicated region fallthrough
CT: control target
= control target key end

     0   :  { %vm31_vm0 = vcmask 523264   ;;  %vm113_vm1 = vcmask 261120   ;;  %s213_s1 = inlined_call_operand.vmem [shape: f32[64,32], index: 1, kind: input, shape index: {}]   ;;  %s214_s0 = inlined_call_operand.vmem [shape: f32[16,64], index: 0, kind: input, shape index: {}]   ;;  %s215_s2 = inlined_call_operand.vmem [shape: f32[1,32], index: 2, kind: input, shape index: {}]   ;;  %s216_s3 = inlined_call_operand.vmem [shape: f32[16,32], index: 3, kind: output, shape index: {}]  }
   0x1   :  { %v23_v0 = vld [vmem:[%s213_s1 + $0x38] sm:$0xff]  ;;  %v22_v1 = vld [vmem:[%s213_s1 + $0x30] sm:$0xff]  ;;  %v21_v2 = vld [vmem:[%s213_s1 + $0x28] sm:$0xff] }
   0x2   :  { %133 = vmatprep.subr.mxu0 %v23_v0  ;;  %v14_v3 = vld [vmem:[%s214_s0] sm:$0xff]  ;;  %v19_v5 = vld [vmem:[%s213_s1 + $0x18] sm:$0xff]  ;;  %v18_v6 = vld [vmem:[%s213_s1 + $0x10] sm:$0xff] }
   0x3   :  { %134 = vmatpush3.msra.mxu0 %v23_v0  ;;  %149 = vmatprep.mubr.msk.f32.mxu0 %vm31_vm0, %v14_v3  ;;  %v20_v4 = vld [vmem:[%s213_s1 + $0x20] sm:$0xff]  ;;  %v17_v7 = vld [vmem:[%s213_s1 + $0x8] sm:$0xff] }
   0x4   :  { %135 = vmatprep.subr.mxu0 %v22_v1  ;;  %v16_v8 = vld [vmem:[%s213_s1] sm:$0xff]  ;;  %v15_v9 = vld [vmem:[%s214_s0 + $0x8] sm:$0xff] }
   0x5   :  { %136 = vmatpush3.msra.mxu0 %v22_v1  ;;  %v120_v10 = vld [vmem:[%s215_s2] ss:$0 sm:$0xff] }
   0x6   :  { %137 = vmatprep.subr.mxu0 %v21_v2 }
   0x7   :  { %138 = vmatpush3.msra.mxu0 %v21_v2 }
   0x8   :  { %139 = vmatprep.subr.mxu0 %v20_v4 }
   0x9   :  { %140 = vmatpush3.msra.mxu0 %v20_v4 }
   0xa   :  { %141 = vmatprep.subr.mxu0 %v19_v5 }
   0xb   :  { %142 = vmatpush3.msra.mxu0 %v19_v5 }
   0xc   :  { %143 = vmatprep.subr.mxu0 %v18_v6 }
   0xd   :  { %144 = vmatpush3.msra.mxu0 %v18_v6 }
   0xe   :  { %145 = vmatprep.subr.mxu0 %v17_v7 }
   0xf   :  { %146 = vmatpush3.msra.mxu0 %v17_v7 }
  0x10   :  { %147 = vmatprep.subr.mxu0 %v16_v8 }
  0x11   :  { %148 = vmatpush3.msra.mxu0 %v16_v8 }
  0x12   :  { %150 = vmatmul.mubr.msk.f32.vlgmr.msra.gmra.mxu0 %vm31_vm0, %v15_v9 }
  0xd2   :  { %v151_v11 = vpop.f32.mrf.mxu0 }
  0xd3   :  { %v110_v12 = vadd.f32 %v151_v11, %v120_v10 }
  0xd4   :  { %v104_v13 = vpop.f32.mrf.mxu0 }
  0xd5   :  { %115 = vst.msk [vmem:[%s216_s3 + $0x8] sm:$0xff] %vm113_vm1, %v110_v12  ;;  %v105_v14 = vadd.f32 %v120_v10, %v104_v13 }
  0xd7   :  { %114 = vst.msk [vmem:[%s216_s3] sm:$0xff] %vm113_vm1, %v105_v14 }

// kernel: transformer_forward.29
= control target key start
LH: loop header
LB: loop body
LE: loop exit
PB: predicated region body
PF: predicated region fallthrough
CT: control target
= control target key end

     0   :  { %vm24_vm0 = vcmask 261120   ;;  %s174_s0 = inlined_call_operand.vmem [shape: f32[16,32], index: 0, kind: input, shape index: {}]   ;;  %s175_s1 = inlined_call_operand.vmem [shape: f32[16,32], index: 1, kind: input, shape index: {}]   ;;  %s176_s2 = inlined_call_operand.vmem [shape: f32[1,32], index: 2, kind: input, shape index: {}]   ;;  %s177_s3 = inlined_call_operand.vmem [shape: f32[1,32], index: 3, kind: input, shape index: {}]   ;;  %s178_s4 = inlined_call_operand.hbm [shape: f32[16,32], index: 4, kind: output, shape index: {}]  }
   0x1   :  { %v18_v0 = vld [vmem:[%s174_s0] sm:$0xff]  ;;  %v19_v2 = vld [vmem:[%s174_s0 + $0x8] sm:$0xff] }
   0x2   :  { %v20_v1 = vld [vmem:[%s175_s1] sm:$0xff]  ;;  %v21_v4 = vld [vmem:[%s175_s1 + $0x8] sm:$0xff] }
   0x3   :  { %v22_v3 = vadd.f32 %v20_v1, %v18_v0 }
   0x4   :  { %9 = vsyncpa [#allocation3], 0  ;;  %v23_v5 = vadd.f32 %v21_v4, %v19_v2  ;;  %v88_v25 = vld [vmem:[%s176_s2] ss:$0 sm:$0xff]  ;;  %s119_s25 = smov [#allocation2]  }
   0x5   :  { %v25_v6 = vsel %vm24_vm0, %v22_v3, 0.0  ;;  %v89_v27 = vld [vmem:[%s177_s3] ss:$0 sm:$0xff]  ;;  %s77_s26 = sshll.u32 %s119_s25, 4  ;;  %s78_s26 = int_to_ptr.vmem [resolvable:$true] %s77_s26 }
   0x6   :  { %26 = vadd.xlane.f32.xlu0 %v25_v6  ;;  %v28_v7 = vsel %vm24_vm0, %v23_v5, 0.0  ;;  %s97_s27 = scalar_lea.vmem %s78_s26, 256  ;;  %p102_p1 = scmp.lt.s32.totalorder %s78_s26, %s78_s26 }
   0x7   :  { %p98_p0 = scmp.ne.s32.totalorder %s78_s26, %s97_s27  ;;  %p103_p2 = scmp.lt.s32.totalorder %s97_s27, %s97_s27 }
   0x9   :  { %p104_p3 = por %p103_p2, %p102_p1 }
   0xa   :  { %29 = vadd.xlane.f32.xlu0 %v28_v7 }
   0xb   :  { %p105_p4 = pnand %p104_p3, %p98_p0 }
  0x8f   :  { %v27_v8 = vpop.xlane.xlu0 %26 }
  0x90   :  { %v32_v9 = vmul.f32 0.03125, %v27_v8 }
  0x92   :  { %v34_v10 = vsub.f32 %v22_v3, %v32_v9 }
  0x93   :  { %v30_v11 = vpop.xlane.xlu0 %29 }
  0x94   :  { %v33_v12 = vmul.f32 0.03125, %v30_v11  ;;  %v36_v13 = vmul.f32 %v34_v10, %v34_v10 }
  0x96   :  { %v35_v14 = vsub.f32 %v23_v5, %v33_v12  ;;  %v38_v15 = vsel %vm24_vm0, %v36_v13, 0.0 }
  0x97   :  { %39 = vadd.xlane.f32.xlu1 %v38_v15 }
  0x98   :  { %v37_v16 = vmul.f32 %v35_v14, %v35_v14 }
  0x9a   :  { %v41_v17 = vsel %vm24_vm0, %v37_v16, 0.0 }
  0x9b   :  { %42 = vadd.xlane.f32.xlu1 %v41_v17 }
 0x120   :  { %v40_v18 = vpop.xlane.xlu1 %39 }
 0x121   :  { %v44_v19 = vmul.f32 0.03125, %v40_v18 }
 0x123   :  { %v46_v20 = vadd.f32 1e-05, %v44_v19 }
 0x124   :  { %v43_v21 = vpop.xlane.xlu1 %42 }
 0x125   :  { %93 = vrsqrt.f32 %v46_v20  ;;  %v45_v22 = vmul.f32 0.03125, %v43_v21 }
 0x127   :  { %v47_v23 = vadd.f32 1e-05, %v45_v22 }
 0x129   :  { %95 = vrsqrt.f32 %v47_v23 }
 0x132   :  { %v94_v24 = vpop.eup %93 }
 0x133   :  { %v50_v26 = vmul.f32 %v94_v24, %v34_v10 }
 0x135   :  { %v59_v28 = vmul.f32 %v88_v25, %v50_v26 }
 0x136   :  { %v96_v29 = vpop.eup %95 }
 0x137   :  { %v51_v30 = vmul.f32 %v96_v29, %v35_v14  ;;  %v68_v31 = vadd.f32 %v89_v27, %v59_v28 }
 0x139   :  { %v60_v32 = vmul.f32 %v88_v25, %v51_v30  ;;  %70 = vst.msk [vmem:[#allocation2] sm:$0xff] %vm24_vm0, %v68_v31 }
 0x13b   :  { %v69_v33 = vadd.f32 %v89_v27, %v60_v32 }
 0x13d   :  { %71 = vst.msk [vmem:[#allocation2 + $0x8] sm:$0xff] %vm24_vm0, %v69_v33 }
 0x13e   :  { %108 = shalt.err (!%p105_p4)
}
 0x13f   :  { %s120_s2 = smov 128   ;;  %s121_s3 = smov 8  }
 0x140   :  { %83 = dma.vmem_to_hbm [thread:$0]  %s78_s26, 256, %s178_s4, [#allocation3], %s120_s2, %s120_s2, %s121_s3  }
 0x141   :  { %117 = dma.done.wait [#allocation3], 256  }
 0x142   :  { %118 = vsyncadd [#allocation3], 4294967040 }
 0x143   :  { %87 = vsyncpa [#allocation3], 1 }

</bundles_post_ra>
